<compile_context>
chip_gen: v6e
topology: v6e:2x2x1
jax: 0.10.0
libtpu: 0.0.40
codegen_flags: <defaults>
</compile_context>

<pallas_src>
import math

import jax
import jax.numpy as jnp
from jax.experimental import pallas as pl
from jax.experimental.pallas import tpu as pltpu


def _round_up(v, m):
    return ((v + m - 1) // m) * m


def _pick_tile(padded, candidates):
    for c in candidates:
        if padded % c == 0:
            return c
    return padded


def _gcnskip_kernel(adj_ref, xk_ref, xi_ref, wg_ref, wl_ref, out_ref, acc_ref):
    k = pl.program_id(1)

    # Skip path, hoisted: computed once per row tile (only at k == 0) and used
    # to initialize the f32 accumulator.
    @pl.when(k == 0)
    def _init():
        acc_ref[...] = jnp.dot(
            xi_ref[...], wl_ref[...], preferred_element_type=jnp.float32
        )

    # On-the-fly support tile: x[k_tile] @ W_g  (bf16 in, f32 accumulate,
    # rounded back to bf16 to feed the second MXU matmul).
    support = jnp.dot(
        xk_ref[...], wg_ref[...], preferred_element_type=jnp.float32
    ).astype(xk_ref.dtype)

    # Main reduction: adj[i_tile, k_tile] @ support[k_tile].
    acc_ref[...] += jnp.dot(
        adj_ref[...], support, preferred_element_type=jnp.float32
    )

    # Finalize: ReLU + cast + lane-dense store on the last reduction step.
    @pl.when(k == pl.num_programs(1) - 1)
    def _finalize():
        out_ref[...] = jnp.maximum(acc_ref[...], 0.0).astype(out_ref.dtype)


def gcnskip_forward(adj, x, weights_g, weights_l, *, tm_max=512, tk_max=1024):
    """Pallas implementation of GCNskip.forward (bias=False, activation=ReLU).

    Returns (adj, output), mirroring the PyTorch module's return value.
    """
    n, f_in = x.shape
    f_out = weights_g.shape[1]
    assert adj.shape[0] == adj.shape[1] == n, "GCN input error!"
    assert weights_g.shape == (f_in, f_out)
    assert weights_l.shape == (f_in, f_out)

    out_dtype = x.dtype

    # Pad to TPU-friendly shapes (8-sublane / 128-lane multiples). Zero padding
    # is semantically inert for every matmul here and is sliced off at the end.
    np_ = _round_up(n, 128)
    fin_p = _round_up(f_in, 128)
    fout_p = _round_up(f_out, 128)

    tm = _pick_tile(np_, (tm_max, 512, 256, 128))
    tk = _pick_tile(np_, (tk_max, 1024, 512, 256, 128))

    cdt = jnp.bfloat16  # compute dtype for MXU operands (f32 accumulation)
    adj_p = jnp.pad(adj.astype(cdt), ((0, np_ - n), (0, np_ - n)))
    x_p = jnp.pad(x.astype(cdt), ((0, np_ - n), (0, fin_p - f_in)))
    wg_p = jnp.pad(weights_g.astype(cdt), ((0, fin_p - f_in), (0, fout_p - f_out)))
    wl_p = jnp.pad(weights_l.astype(cdt), ((0, fin_p - f_in), (0, fout_p - f_out)))

    grid = (np_ // tm, np_ // tk)

    # Advisory cost estimate so XLA schedules surrounding ops sensibly.
    flops = (
        2 * np_ * np_ * fout_p                      # adj @ support
        + 2 * grid[0] * np_ * fin_p * fout_p        # support recomputed per row tile
        + 2 * np_ * fin_p * fout_p                  # skip path
    )
    bytes_accessed = (
        np_ * np_ * 2          # adj (bf16)
        + 2 * np_ * fin_p * 2  # x, streamed twice (bf16)
        + 2 * fin_p * fout_p * 2
        + np_ * fout_p * 4     # f32 output
    )

    out_p = pl.pallas_call(
        _gcnskip_kernel,
        out_shape=jax.ShapeDtypeStruct((np_, fout_p), jnp.float32),
        grid_spec=pltpu.PrefetchScalarGridSpec(
            num_scalar_prefetch=0,
            grid=grid,
            in_specs=[
                pl.BlockSpec((tm, tk), lambda i, k: (i, k)),        # adj tile
                pl.BlockSpec((tk, fin_p), lambda i, k: (k, 0)),     # x for support
                pl.BlockSpec((tm, fin_p), lambda i, k: (i, 0)),     # x for skip
                pl.BlockSpec((fin_p, fout_p), lambda i, k: (0, 0)),  # W_g (resident)
                pl.BlockSpec((fin_p, fout_p), lambda i, k: (0, 0)),  # W_l (resident)
            ],
            out_specs=pl.BlockSpec((tm, fout_p), lambda i, k: (i, 0)),
            scratch_shapes=[pltpu.VMEM((tm, fout_p), jnp.float32)],
        ),
        compiler_params=pltpu.CompilerParams(
            dimension_semantics=("parallel", "arbitrary"),
        ),
        cost_estimate=pl.CostEstimate(
            flops=flops, transcendentals=0, bytes_accessed=bytes_accessed
        ),
    )(adj_p, x_p, x_p, wg_p, wl_p)

    out = out_p[:n, :f_out].astype(out_dtype)
    return adj, out


def _reference_forward_f32(adj, x, weights_g, weights_l):
    support = x @ weights_g
    out = adj @ support + x @ weights_l
    return jnp.maximum(out, 0.0)


def _reference_forward_bf16(adj, x, weights_g, weights_l):
    # Mirrors the kernel's numerics: bf16 operands, f32 accumulation, support
    # rounded to bf16 before the adj matmul.
    f32 = jnp.float32
    bf = jnp.bfloat16
    a = adj.astype(bf).astype(f32)
    xx = x.astype(bf).astype(f32)
    wg = weights_g.astype(bf).astype(f32)
    wl = weights_l.astype(bf).astype(f32)
    support = (xx @ wg).astype(bf).astype(f32)
    out = a @ support + xx @ wl
    return jnp.maximum(out, 0.0)


if __name__ == "__main__":
    # Small graph, consistent with the module: N nodes, F_in -> F_out features.
    # N is deliberately not a multiple of 128 to exercise the padding path,
    # and large enough to produce a multi-step (i, k) grid.
    N, F_IN, F_OUT = 300, 48, 32

    key = jax.random.PRNGKey(0)
    k_adj, k_x, k_wg, k_wl = jax.random.split(key, 4)

    adj = jax.random.uniform(k_adj, (N, N), dtype=jnp.float32)
    x = jax.random.uniform(k_x, (N, F_IN), dtype=jnp.float32)

    # Parameter init matching reset_parameters(): uniform(-std, std),
    # std = 1 / sqrt(output_features).
    std = 1.0 / math.sqrt(F_OUT)
    weights_g = jax.random.uniform(
        k_wg, (F_IN, F_OUT), dtype=jnp.float32, minval=-std, maxval=std
    )
    weights_l = jax.random.uniform(
        k_wl, (F_IN, F_OUT), dtype=jnp.float32, minval=-std, maxval=std
    )

    adj_out, out = gcnskip_forward(adj, x, weights_g, weights_l)
    out = jax.block_until_ready(out)
    assert out.shape == (N, F_OUT)
    assert jnp.array_equal(adj_out, adj)

    # Tight check against a reference that mirrors the kernel's bf16/f32 math.
    ref_bf16 = _reference_forward_bf16(adj, x, weights_g, weights_l)
    assert jnp.allclose(out, ref_bf16, atol=1e-3, rtol=1e-3), "mismatch vs bf16 reference"

    # Loose sanity check against the pure-f32 module semantics (bf16 operands
    # bound the error; accumulation stays f32).
    ref_f32 = _reference_forward_f32(adj, x, weights_g, weights_l)
    assert jnp.allclose(out, ref_f32, atol=1e-1, rtol=1e-1), "mismatch vs f32 reference"

    print("KERNEL_OK")
</pallas_src>

<mosaic_0001>
module attributes {stable_mosaic.version = 11 : i64} {
  func.func @_gcnskip_kernel(%arg0: i32, %arg1: i32, %arg2: memref<128x128xbf16, #tpu.memory_space<vmem>>, %arg3: memref<128x128xbf16, #tpu.memory_space<vmem>>, %arg4: memref<128x128xbf16, #tpu.memory_space<vmem>>, %arg5: memref<128x128xbf16, #tpu.memory_space<vmem>>, %arg6: memref<128x128xbf16, #tpu.memory_space<vmem>>, %arg7: memref<128x128xf32, #tpu.memory_space<vmem>>, %arg8: memref<128x128xf32, #tpu.memory_space<vmem>>) attributes {dimension_semantics = [#tpu.dimension_semantics<parallel>, #tpu.dimension_semantics<arbitrary>], iteration_bounds = array<i64: 3, 3>, scalar_prefetch = 0 : i64, scratch_operands = 1 : i64, tpu.core_type = #tpu.core_type<tc>, window_params = [{transform_indices = @transform_0, window_bounds = array<i64: 128, 128>}, {transform_indices = @transform_1, window_bounds = array<i64: 128, 128>}, {transform_indices = @transform_2, window_bounds = array<i64: 128, 128>}, {pipeline_mode = #tpu.pipeline_mode<synchronous>, transform_indices = @transform_3, window_bounds = array<i64: 128, 128>}, {pipeline_mode = #tpu.pipeline_mode<synchronous>, transform_indices = @transform_4, window_bounds = array<i64: 128, 128>}, {transform_indices = @transform_5, window_bounds = array<i64: 128, 128>}]} {
    %c0_i32 = arith.constant 0 : i32
    %0 = arith.cmpi eq, %arg1, %c0_i32 : i32
    %1 = arith.extui %0 : i1 to i32
    %c0_i32_0 = arith.constant 0 : i32
    %2 = arith.cmpi ne, %1, %c0_i32_0 : i32
    scf.if %2 {
      %c0_12 = arith.constant 0 : index
      %c0_13 = arith.constant 0 : index
      %15 = vector.load %arg4[%c0_12, %c0_13] : memref<128x128xbf16, #tpu.memory_space<vmem>>, vector<128x128xbf16>
      %c0_14 = arith.constant 0 : index
      %c0_15 = arith.constant 0 : index
      %16 = vector.load %arg6[%c0_14, %c0_15] : memref<128x128xbf16, #tpu.memory_space<vmem>>, vector<128x128xbf16>
      %cst_16 = arith.constant dense<0.000000e+00> : vector<128x128xf32>
      %17 = tpu.matmul %15, %16, %cst_16 {dimension_numbers = #tpu.dot_dimension_numbers<[1], [0], [0], [1], [0, 0, 1, 1], [], []>} : vector<128x128xbf16>, vector<128x128xbf16>, vector<128x128xf32> -> vector<128x128xf32>
      %c0_17 = arith.constant 0 : index
      %c0_18 = arith.constant 0 : index
      %18 = vector.load %arg8[%c0_17, %c0_18] : memref<128x128xf32, #tpu.memory_space<vmem>>, vector<128x128xf32>
      tpu.vector_store %arg8[%c0_17, %c0_18], %17 {strides = array<i32>} : memref<128x128xf32, #tpu.memory_space<vmem>>, vector<128x128xf32>,
    } else {
    }
    %c0 = arith.constant 0 : index
    %c0_1 = arith.constant 0 : index
    %3 = vector.load %arg3[%c0, %c0_1] : memref<128x128xbf16, #tpu.memory_space<vmem>>, vector<128x128xbf16>
    %c0_2 = arith.constant 0 : index
    %c0_3 = arith.constant 0 : index
    %4 = vector.load %arg5[%c0_2, %c0_3] : memref<128x128xbf16, #tpu.memory_space<vmem>>, vector<128x128xbf16>
    %cst = arith.constant dense<0.000000e+00> : vector<128x128xf32>
    %5 = tpu.matmul %3, %4, %cst {dimension_numbers = #tpu.dot_dimension_numbers<[1], [0], [0], [1], [0, 0, 1, 1], [], []>} : vector<128x128xbf16>, vector<128x128xbf16>, vector<128x128xf32> -> vector<128x128xf32>
    %6 = arith.truncf %5 : vector<128x128xf32> to vector<128x128xbf16>
    %c0_4 = arith.constant 0 : index
    %c0_5 = arith.constant 0 : index
    %7 = vector.load %arg8[%c0_4, %c0_5] : memref<128x128xf32, #tpu.memory_space<vmem>>, vector<128x128xf32>
    %c0_6 = arith.constant 0 : index
    %c0_7 = arith.constant 0 : index
    %8 = vector.load %arg2[%c0_6, %c0_7] : memref<128x128xbf16, #tpu.memory_space<vmem>>, vector<128x128xbf16>
    %cst_8 = arith.constant dense<0.000000e+00> : vector<128x128xf32>
    %9 = tpu.matmul %8, %6, %cst_8 {dimension_numbers = #tpu.dot_dimension_numbers<[1], [0], [0], [1], [0, 0, 1, 1], [], []>} : vector<128x128xbf16>, vector<128x128xbf16>, vector<128x128xf32> -> vector<128x128xf32>
    %10 = arith.addf %7, %9 : vector<128x128xf32>
    %c0_9 = arith.constant 0 : index
    %c0_10 = arith.constant 0 : index
    %11 = vector.load %arg8[%c0_9, %c0_10] : memref<128x128xf32, #tpu.memory_space<vmem>>, vector<128x128xf32>
    tpu.vector_store %arg8[%c0_9, %c0_10], %10 {strides = array<i32>} : memref<128x128xf32, #tpu.memory_space<vmem>>, vector<128x128xf32>,
    %c2_i32 = arith.constant 2 : i32
    %12 = arith.cmpi eq, %arg1, %c2_i32 : i32
    %13 = arith.extui %12 : i1 to i32
    %c0_i32_11 = arith.constant 0 : i32
    %14 = arith.cmpi ne, %13, %c0_i32_11 : i32
    scf.if %14 {
      %c0_12 = arith.constant 0 : index
      %c0_13 = arith.constant 0 : index
      %15 = vector.load %arg8[%c0_12, %c0_13] : memref<128x128xf32, #tpu.memory_space<vmem>>, vector<128x128xf32>
      %cst_14 = arith.constant 0.000000e+00 : f32
      %16 = vector.broadcast %cst_14 : f32 to vector<128x128xf32>
      %17 = arith.maximumf %15, %16 : vector<128x128xf32>
      %c0_15 = arith.constant 0 : index
      %c0_16 = arith.constant 0 : index
      %18 = vector.load %arg7[%c0_15, %c0_16] : memref<128x128xf32, #tpu.memory_space<vmem>>, vector<128x128xf32>
      tpu.vector_store %arg7[%c0_15, %c0_16], %17 {strides = array<i32>} : memref<128x128xf32, #tpu.memory_space<vmem>>, vector<128x128xf32>,
    } else {
    }
    return
  }
  func.func @transform_0(%arg0: i32, %arg1: i32) -> (i32, i32) {
    %c0_i32 = arith.constant 0 : i32
    return %arg0, %arg1 : i32, i32
  }
  func.func @transform_1(%arg0: i32, %arg1: i32) -> (i32, i32) {
    %c0_i32 = arith.constant 0 : i32
    %c0_i32_0 = arith.constant 0 : i32
    return %arg1, %c0_i32 : i32, i32
  }
  func.func @transform_2(%arg0: i32, %arg1: i32) -> (i32, i32) {
    %c0_i32 = arith.constant 0 : i32
    %c0_i32_0 = arith.constant 0 : i32
    return %arg0, %c0_i32 : i32, i32
  }
  func.func @transform_3(%arg0: i32, %arg1: i32) -> (i32, i32) {
    %c0_i32 = arith.constant 0 : i32
    %c0_i32_0 = arith.constant 0 : i32
    %c0_i32_1 = arith.constant 0 : i32
    return %c0_i32, %c0_i32_0 : i32, i32
  }
  func.func @transform_4(%arg0: i32, %arg1: i32) -> (i32, i32) {
    %c0_i32 = arith.constant 0 : i32
    %c0_i32_0 = arith.constant 0 : i32
    %c0_i32_1 = arith.constant 0 : i32
    return %c0_i32, %c0_i32_0 : i32, i32
  }
  func.func @transform_5(%arg0: i32, %arg1: i32) -> (i32, i32) {
    %c0_i32 = arith.constant 0 : i32
    %c0_i32_0 = arith.constant 0 : i32
    return %arg0, %c0_i32 : i32, i32
  }
}

</mosaic_0001>

<bundles_post_ra>
// kernel: tpu_custom_call.1
= control target key start
LH: loop header
LB: loop body
LE: loop exit
PB: predicated region body
PF: predicated region fallthrough
CT: control target
= control target key end

     0   :  { %s2470_s0 = inlined_call_operand.hbm [shape: bf16[384,384], index: 0, kind: input, shape index: {}]   ;;  %s2471_s1 = inlined_call_operand.hbm [shape: bf16[384,128], index: 1, kind: input, shape index: {}]   ;;  %s2472_s2 = inlined_call_operand.hbm [shape: bf16[384,128], index: 2, kind: input, shape index: {}]   ;;  %s2473_s3 = inlined_call_operand.hbm [shape: bf16[128,128], index: 3, kind: input, shape index: {}]   ;;  %s2474_s4 = inlined_call_operand.hbm [shape: bf16[128,128], index: 4, kind: input, shape index: {}]   ;;  %s2475_s5 = inlined_call_operand.hbm [shape: f32[384,128], index: 5, kind: output, shape index: {}]  }
   0x1   :  { %2493 = sst [smem:[#allocation27_spill]] %s2470_s0 }
   0x2   :  { %2494 = sst [smem:[#allocation28_spill]] %s2471_s1 }
   0x3   :  { %2495 = sst [smem:[#allocation29_spill]] %s2472_s2 }
   0x4   :  { %2496 = sst [smem:[#allocation30_spill]] %s2473_s3 }
   0x5   :  { %2497 = sst [smem:[#allocation31_spill]] %s2474_s4 }
   0x6   :  { %2498 = sst [smem:[#allocation32_spill]] %s2475_s5 }
   0x7   :  { %10 = vsyncpa [#allocation4], 0 }
   0x8   :  { %12 = vsyncpa [#allocation4 + $0x1], 0 }
   0x9   :  { %13 = vsyncpa [#allocation7], 0 }
   0xa   :  { %15 = vsyncpa [#allocation7 + $0x1], 0 }
   0xb   :  { %16 = vsyncpa [#allocation10], 0 }
   0xc   :  { %17 = vsyncpa [#allocation5], 0 }
   0xd   :  { %19 = vsyncpa [#allocation5 + $0x1], 0  ;;  %s2042_s18 = smov 0   ;;  %s2044_s19 = smov 0  }
   0xe   :  { %s2046_s20 = smov 0   ;;  %s2048_s21 = smov 0  }
   0xf   :  { %s2050_s22 = smov 0   ;;  %s2052_s23 = smov 0  }
  0x10   :  { %s2054_s24 = smov 0   ;;  %s2056_s25 = smov 0  }
  0x11   :  { %s2058_s26 = smov 0   ;;  %s2060_s27 = smov 0  }
  0x12   :  { %s2062_s28 = smov 0   ;;  %s2064_s29 = smov 0  }
  0x13   :  { %s2066_s30 = smov 0   ;;  %s2068_s6 = smov 0  }
  0x14 LB: > { %2499 = sst [smem:[#allocation18_spill]] %s1963_s22  ;;  %s2113_s7 = sadd.s32 4294967295, %s1999_s6   ;;  %s1999_s6 = sphi %s2068_s6, %s25_s6   ;;  %s1995_s30 = sphi %s2066_s30, %s2554_s30   ;;  %s1991_s29 = sphi %s2064_s29, %s2564_s29   ;;  %s1987_s28 = sphi %s2062_s28, %s2552_s28   ;;  %s1983_s27 = sphi %s2060_s27, %s2563_s27   ;;  %s1979_s26 = sphi %s2058_s26, %s2562_s26   ;;  %s1975_s25 = sphi %s2056_s25, %s2561_s25   ;;  %s1971_s24 = sphi %s2054_s24, %s2560_s24   ;;  %s1967_s23 = sphi %s2052_s23, %s2559_s23   ;;  %s1963_s22 = sphi %s2050_s22, %s2558_s22   ;;  %s1959_s21 = sphi %s2048_s21, %s2550_s21   ;;  %s1955_s20 = sphi %s2046_s20, %s2557_s20   ;;  %s1951_s19 = sphi %s2044_s19, %s2556_s19   ;;  %s1947_s18 = sphi %s2042_s18, %s2555_s18  }
  0x15   : > { %2500 = sst [smem:[#allocation19_spill]] %s1983_s27  ;;  %p1273_p0 = scmp.ge.s32.totalorder %s1999_s6, 1 }
  0x16   : > { %2501 = sst [smem:[#allocation20_spill]] %s1987_s28  ;;  %p2488_p1 = scmp.eq.s32.totalorder %s2113_s7, 0 }
  0x17   : > { %2502 = sst [smem:[#allocation21_spill]] %s1995_s30  ;;  %p190_p3 = scmp.lt.s32.totalorder %s1999_s6, 10 }
  0x18   : > { %s2001_s9 = smov [#allocation9]  }
  0x19   : > { %p2119_p4 = pnand %p1273_p0, %p190_p3  ;;  %s202_s10 = sshll.u32 %s2001_s9, 4  ;;  %s203_s10 = int_to_ptr.vmem [resolvable:$true] %s202_s10 }
  0x1a   : > { %s1718_s12 = scalar_lea.vmem %s203_s10, 1024  ;;  %p1726_p11 = scmp.lt.s32.totalorder %s203_s10, %s203_s10 }
  0x1b   : > { %s2503_s8 = scalar_select %p2119_p4, 1, 0 }
  0x1c   : > { %p1521_p5 = pneg %p2119_p4  ;;  %p1719_p8 = scmp.ne.s32.totalorder %s203_s10, %s1718_s12 }
  0x1d   : > { %2504 = sst [smem:[#allocation22_spill]] %s2503_s8  ;;  %p1727_p12 = scmp.lt.s32.totalorder %s1718_s12, %s1718_s12 }
  0x1e   : > { %p2127_p6 = pnand %p1521_p5, %p2488_p1 }
  0x1f   : > { %p1728_p13 = por %p1727_p12, %p1726_p11 }
  0x20   : > { %p1709_p7 = pneg %p2127_p6 }
  0x22   : > { %p1721_p9 = pnand %p1719_p8, %p1709_p7 }
  0x24   : > { %p1722_p10 = pneg %p1721_p9 }
  0x26   : > { %p1729_p0 = pnand %p1728_p13, %p1722_p10 }
  0x28   : > { %1732 = shalt.err (!%p1729_p0)
}
  0x29   : > { %s2477_s13 = smov 64   ;;  %s2479_s14 = smov 4  }
  0x2a   : > { %s2506_s3 = sld [smem:[#allocation30_spill]]  ;;  %s34_s17 = sadd.s32 1, %s1991_s29 }
  0x2b   : > { %s37_s9 = sadd.s32 1, %s1995_s30  ;;  %p35_p3 = scmp.ge.s32.totalorder %s34_s17, 3 }
  0x2c   : > { %p2489_p5 = scmp.eq.s32.totalorder %s1999_s6, 0  ;;  %s72_s12 = sadd.s32 1, %s1967_s23 }
  0x2d   : > { %p79_p8 = scmp.ne.s32.totalorder %s1967_s23, %s1963_s22  ;;  %s2566_s17 = smov (%p35_p3, %s34_s17), 0 }
  0x2e   : > { %2507 = sst [smem:[#allocation23_spill]] %s2566_s17  ;;  %s2568_s9 = smov (!%p35_p3, %s37_s9), %s1995_s30 }
  0x2f   : > { %s42_s5 = ssub.s32 %s1991_s29, %s2566_s17  ;;  %p2157_p9 = por %p79_p8, %p2489_p5 }
  0x30   : > { %1524 = dma.hbm_to_vmem [thread:$0]  (!%p2127_p6), %s2506_s3, 1024, %s203_s10, [#allocation10], %s2477_s13, %s2477_s13, %s2479_s14  }
  0x31   : > { %p39_p10 = scmp.ge.s32.totalorder %s2568_s9, 3  ;;  %p70_p11 = scmp.eq.s32.totalorder %s42_s5, 0 }
  0x32   : > { %p85_p12 = scmp.ne.s32.totalorder %s1963_s22, %s1959_s21  ;;  %p2487_p13 = scmp.lt.s32.totalorder %s1999_s6, 9 }
  0x33   : > { %s2570_s9 = smov (%p39_p10, %s2568_s9), 0  ;;  %s252_s3 = sand.u32 1, %s1999_s6  }
  0x34   : > { %2509 = sst [smem:[#allocation24_spill]] %s2570_s9  ;;  %s2171_s16 = ssub.s32 %s1995_s30, %s2570_s9 }
  0x35   : > { %s2167_s15 = scalar_select %p70_p11, %s1967_s23, %s72_s12  }
  0x36   : > { %p2175_p0 = por %p85_p12, %p2488_p1  ;;  %s43_s14 = sor.u32 %s42_s5, %s2171_s16 }
  0x37   : > { %2510 = sst [smem:[#allocation25_spill]] %s2167_s15  ;;  %p2181_p8 = scmp.eq.s32.totalorder %s43_s14, 0 }
  0x38   : > { %s2511_s13 = scalar_select %p2175_p0, 1, 0 }
  0x39   : > { %s254_s17 = sand.u32 1, %s1967_s23   ;;  %s1341_s12 = sshll.u32 %s1991_s29, 10 }
  0x3a   : > { %2512 = sst [smem:[#allocation26_spill]] %s2511_s13  ;;  %s1281_s28 = sshll.u32 %s254_s17, 6 }
  0x3b   : > { %s2514_s1 = sld [smem:[#allocation28_spill]]  ;;  %s256_s22 = scalar_lea.vmem [#allocation6], %s1281_s28 }
  0x3c   : > { %s263_s8 = sshll.u32 %s256_s22, 4  ;;  %p2195_p10 = pnand %p2487_p13, %p2157_p9  ;;  %s264_s8 = int_to_ptr.vmem [resolvable:$true] %s263_s8 }
  0x3d   : > { %s2004_s5 = smov [#allocation11]   ;;  %s2199_s2 = scalar_lea.sflag [#allocation7], %s252_s3 }
  0x3e   : > { %s215_s14 = sshll.u32 %s2004_s5, 4  ;;  %p1735_p11 = pneg %p2195_p10  ;;  %s216_s14 = int_to_ptr.vmem [resolvable:$true] %s215_s14 }
  0x3f   : > { %s1746_s17 = scalar_lea.vmem %s264_s8, 1024  ;;  %s2005_s28 = smov [#allocation6]  }
  0x40   : > { %p1747_p12 = scmp.ne.s32.totalorder %s264_s8, %s1746_s17  ;;  %s1751_s22 = sshll.u32 %s2005_s28, 4  ;;  %s1752_s22 = int_to_ptr.vmem [resolvable:$false] %s1751_s22 }
  0x41   : > { %s262_s27 = scalar_lea.hbm %s2514_s1, %s1341_s12  ;;  %s1753_s9 = scalar_lea.vmem %s1752_s22, 2048 }
  0x42   : > { %p1749_p2 = pnand %p1747_p12, %p1735_p11  ;;  %p1754_p9 = scmp.lt.s32.totalorder %s264_s8, %s1752_s22 }
  0x43   : > { %p1755_p13 = scmp.lt.s32.totalorder %s1753_s9, %s1746_s17 }
  0x44   : > { %p1750_p3 = pneg %p1749_p2 }
  0x45   : > { %p1756_p1 = por %p1755_p13, %p1754_p9 }
  0x47   : > { %p1757_p5 = pnand %p1756_p1, %p1750_p3 }
  0x49   : > { %1760 = shalt.err (!%p1757_p5)
}
  0x4a   : > { %s2516_s10 = smov 4   ;;  %s2517_s3 = smov 64  }
  0x4b   : > { %1534 = dma.hbm_to_vmem [thread:$0]  (!%p2195_p10), %s262_s27, 1024, %s264_s8, %s2199_s2, %s2517_s3, %s2517_s3, %s2516_s10  }
  0x4c   : > { %s1772_s15 = scalar_lea.vmem %s216_s14, 1024  ;;  %p1780_p0 = scmp.lt.s32.totalorder %s216_s14, %s216_s14 }
  0x4d   : > { %p1773_p2 = scmp.ne.s32.totalorder %s216_s14, %s1772_s15  ;;  %p1781_p4 = scmp.lt.s32.totalorder %s1772_s15, %s1772_s15 }
  0x4f   : > { %p1775_p11 = pnand %p1773_p2, %p1709_p7  ;;  %p1782_p13 = por %p1781_p4, %p1780_p0 }
  0x51   : > { %p1776_p12 = pneg %p1775_p11 }
  0x53   : > { %p1783_p1 = pnand %p1782_p13, %p1776_p12 }
  0x55   : > { %1786 = shalt.err (!%p1783_p1)
}
  0x56   : > { %s2518_s4 = sld [smem:[#allocation31_spill]]  ;;  %s46_s27 = sadd.s32 1, %s1979_s26 }
  0x57   : > { %s2224_s8 = scalar_select %p2181_p8, %s1979_s26, %s46_s27  }
  0x58   : > { %p53_p4 = scmp.ne.s32.totalorder %s1979_s26, %s1975_s25  ;;  %p59_p7 = scmp.ne.s32.totalorder %s1975_s25, %s1971_s24 }
  0x59   : > { %s229_s11 = sand.u32 1, %s1979_s26   ;;  %s1504_s5 = smul.u32 48, %s1995_s30 }
  0x5a   : > { %p2519_p5 = scmp.eq.s32.totalorder %s1999_s6, 0  ;;  %p2520_p3 = scmp.eq.s32.totalorder %s2113_s7, 0 }
  0x5b   : > { %s1277_s28 = sshll.u32 %s229_s11, 6  ;;  %s239_s22 = sadd.s32 %s1991_s29, %s1504_s5 }
  0x5c   : > { %1527 = dma.hbm_to_vmem [thread:$0]  (!%p2127_p6), %s2518_s4, 1024, %s216_s14, [#allocation10], %s2517_s3, %s2517_s3, %s2516_s10  }
  0x5d   : > { %p55_p0 = por %p2519_p5, %p53_p4  ;;  %p2236_p10 = por %p2520_p3, %p59_p7 }
  0x5e   : > { %s1280_s9 = sshll.u32 %s239_s22, 6  ;;  %s233_s14 = scalar_lea.vmem [#allocation3], %s1277_s28 }
  0x5f   : > { %s242_s15 = sshll.u32 %s233_s14, 4  ;;  %s2522_s0 = sld [smem:[#allocation27_spill]]  ;;  %s243_s15 = int_to_ptr.vmem [resolvable:$true] %s242_s15 }
  0x60   : > { %p2523_p6 = scmp.lt.s32.totalorder %s1999_s6, 9  ;;  %s230_s27 = scalar_lea.sflag [#allocation4], %s229_s11 }
  0x61   : > { %s1800_s1 = scalar_lea.vmem %s243_s15, 1024  ;;  %s2006_s5 = smov [#allocation3]  }
  0x62   : > { %p2246_p8 = pnand %p2523_p6, %p55_p0  ;;  %p1801_p2 = scmp.ne.s32.totalorder %s243_s15, %s1800_s1 }
  0x63   : > { %s1805_s28 = sshll.u32 %s2006_s5, 4  ;;  %s1806_s28 = int_to_ptr.vmem [resolvable:$false] %s1805_s28 }
  0x64   : > { %p1789_p9 = pneg %p2246_p8  ;;  %s1807_s22 = scalar_lea.vmem %s1806_s28, 2048 }
  0x65   : > { %s241_s12 = scalar_lea.hbm %s2522_s0, %s1280_s9  ;;  %p1808_p13 = scmp.lt.s32.totalorder %s243_s15, %s1806_s28 }
  0x66   : > { %p1803_p11 = pnand %p1801_p2, %p1789_p9  ;;  %p1809_p1 = scmp.lt.s32.totalorder %s1807_s22, %s1800_s1 }
  0x68   : > { %p1804_p12 = pneg %p1803_p11  ;;  %p1810_p4 = por %p1809_p1, %p1808_p13 }
  0x6a   : > { %p1811_p7 = pnand %p1810_p4, %p1804_p12 }
  0x6c   : > { %1814 = shalt.err (!%p1811_p7)
}
  0x6d   : > { %s2007_s9 = smov 192   ;;  %s1272_s1 = sadd.s32 4294967294, %s1999_s6  }
  0x6e   : > { %1531 = dma.hbm_to_vmem [thread:$0]  (!%p2246_p8), %s241_s12, 1024, %s243_s15, %s230_s27, %s2007_s9, %s2517_s3, %s2516_s10  }
  0x6f   : > { %s98_s11 = sadd.s32 1, %s1955_s20  ;;  %p105_p5 = scmp.ne.s32.totalorder %s1955_s20, %s1951_s19 }
  0x70   : > { %p2525_p0 = scmp.eq.s32.totalorder %s2171_s16, 0  ;;  %p2526_p3 = scmp.eq.s32.totalorder %s1999_s6, 0 }
  0x71   : > { %p111_p9 = scmp.ne.s32.totalorder %s1951_s19, %s1947_s18  ;;  %p2528_p2 = scmp.eq.s32.totalorder %s2113_s7, 8 }
  0x72   : > { %s2263_s14 = scalar_select %p2525_p0, %s1955_s20, %s98_s11  }
  0x73   : > { %p2267_p6 = por %p105_p5, %p2526_p3  ;;  %p2275_p11 = por %p2528_p2, %p105_p5 }
  0x74   : > { %p183_p8 = scmp.eq.s32.totalorder %s1272_s1, 8  ;;  %p2530_p12 = scmp.eq.s32.totalorder %s2113_s7, 0 }
  0x75   : > { %s275_s16 = sand.u32 1, %s1955_s20   ;;  %s1342_s27 = sshll.u32 %s1995_s30, 10 }
  0x76   : > { %p2281_p13 = por %p111_p9, %p2530_p12  ;;  %p2286_p1 = por %p183_p8, %p111_p9 }
  0x77   : > { %s1284_s24 = sshll.u32 %s275_s16, 6  ;;  %s2533_s22 = sld [smem:[#allocation29_spill]] }
  0x78   : > { %s2532_s12 = scalar_select %p2286_p1, 1, 0 }
  0x79   : > { %s277_s11 = scalar_lea.vmem [#allocation8], %s1284_s24  ;;  %p2534_p4 = scmp.lt.s32.totalorder %s1999_s6, 9 }
  0x7a   : > { %s284_s0 = sshll.u32 %s277_s11, 4  ;;  %s2008_s16 = smov [#allocation8]   ;;  %s285_s0 = int_to_ptr.vmem [resolvable:$true] %s284_s0 }
  0x7b   : > { %p2298_p7 = pnand %p2534_p4, %p2267_p6  ;;  %s1828_s4 = scalar_lea.vmem %s285_s0, 1024 }
  0x7c   : > { %p1829_p0 = scmp.ne.s32.totalorder %s285_s0, %s1828_s4  ;;  %s1833_s30 = sshll.u32 %s2008_s16, 4  ;;  %s1834_s30 = int_to_ptr.vmem [resolvable:$false] %s1833_s30 }
  0x7d   : > { %s283_s9 = scalar_lea.hbm %s2533_s22, %s1342_s27  ;;  %p1817_p5 = pneg %p2298_p7 }
  0x7e   : > { %s1835_s27 = scalar_lea.vmem %s1834_s30, 2048  ;;  %p1836_p2 = scmp.lt.s32.totalorder %s285_s0, %s1834_s30 }
  0x7f   : > { %p1831_p3 = pnand %p1829_p0, %p1817_p5  ;;  %p1837_p8 = scmp.lt.s32.totalorder %s1835_s27, %s1828_s4 }
  0x81   : > { %p1832_p9 = pneg %p1831_p3  ;;  %p1838_p12 = por %p1837_p8, %p1836_p2 }
  0x83   : > { %p1839_p1 = pnand %p1838_p12, %p1832_p9 }
  0x85   : > { %1842 = shalt.err (!%p1839_p1)
}
  0x86   : > { %1537 = dma.hbm_to_vmem [thread:$0]  (!%p2298_p7), %s283_s9, 1024, %s285_s0, %s2199_s2, %s2517_s3, %s2517_s3, %s2516_s10  }
  0x87   : > { %s2536_s13 = sld [smem:[#allocation22_spill]] }
  0x8d   : > { %p2537_p6 = scmp.ne.s32.totalorder %s2536_s13, 0 }
  0x8e   : > { %s298_s24 = sand.u32 (!%p2537_p6), 1, %s1975_s25  }
  0x8f   : > { %296 = sbr.rel (%p2537_p6) target bundleno = 970 (0x3ca), region = 40  ;;  %s1288_s5 = sshll.u32 (!%p2537_p6), %s298_s24, 6 }
  0x90   : > { %s299_s28 = scalar_lea.sflag (!%p2537_p6), [#allocation4], %s298_s24  ;;  %s2313_s30 = scalar_lea.vmem (!%p2537_p6), [#allocation3], %s1288_s5 }
  0x94   : > { %1926 = dma.done.wait (%p2236_p10), %s299_s28, 1024  }
  0x95   : > { %1928 = vsyncadd (%p2236_p10), %s299_s28, 4294966272  ;;  %s2538_s4 = sld [smem:[#allocation18_spill]]  ;;  %s307_s11 = sand.u32 1, %s2113_s7  }
  0x96   : > { %s2539_s22 = sld [smem:[#allocation26_spill]]  ;;  %s308_s10 = scalar_lea.sflag [#allocation7], %s307_s11 }
  0x9b   : > { %s309_s0 = sand.u32 1, %s2538_s4  }
  0x9c   : > { %s1289_s2 = sshll.u32 %s309_s0, 6  ;;  %p2540_p1 = scmp.ne.s32.totalorder %s2539_s22, 0 }
  0x9d   : > { %s2321_s3 = scalar_lea.vmem [#allocation6], %s1289_s2 }
  0x9e   : > { %1930 = dma.done.wait (%p2540_p1), %s308_s10, 1024  }
  0x9f   : > { %1932 = vsyncadd (%p2540_p1), %s308_s10, 4294966272  ;;  %s2328_s9 = sand.u32 1, %s1951_s19  }
  0xa0   : > { %s1290_s17 = sshll.u32 %s2328_s9, 6 }
  0xa1   : > { %s2331_s1 = scalar_lea.vmem [#allocation8], %s1290_s17 }
  0xa2   : > { %1934 = dma.done.wait (%p2281_p13), %s308_s10, 1024  }
  0xa3   : > { %1936 = vsyncadd (%p2281_p13), %s308_s10, 4294966272  ;;  %p2541_p10 = scmp.eq.s32.totalorder %s2113_s7, 0 }
  0xa5   : > { %1938 = dma.done.wait (%p2541_p10), [#allocation10], 2048   ;;  %p2542_p4 = pmov %p2541_p10 }
  0xa6   : > { %s1293_s16 = sshll.u32 %s2328_s9, 7  ;;  %s2543_s13 = sld [smem:[#allocation19_spill]] }
  0xa7   : > { %1940 = vsyncadd (%p2542_p4), [#allocation10], 4294965248  ;;  %s2342_s27 = scalar_lea.vmem [#allocation12], %s1293_s16 }
  0xac   : > { %p1294_p7 = scmp.ne.s32.totalorder %s2543_s13, 0 }
  0xae   : > { %373 = sbr.rel (%p1294_p7) target bundleno = 420 (0x1a4), region = 64 }
  0xb3   : > { %v1667_v0 = vld [vmem:[#allocation11 + $0x38] sm:$0xff]   ;;  %v1668_v1 = vld [vmem:[#allocation11 + $0x30] sm:$0xff]   ;;  %v1669_v2 = vld [vmem:[#allocation11 + $0x28] sm:$0xff]  }
  0xb4   : > { %1392 = vmatprep.subr.bf16.mxu0 %v1667_v0  ;;  %1488 = vmatprep.subr.bf16.mxu1 %v1667_v0  ;;  %v1670_v3 = vld [vmem:[#allocation11 + $0x20] sm:$0xff]   ;;  %v1671_v6 = vld [vmem:[#allocation11 + $0x18] sm:$0xff]   ;;  %v1672_v7 = vld [vmem:[#allocation11 + $0x10] sm:$0xff]  }
  0xb5   : > { %1393 = vmatpush3.bf16.msra.mxu0 %v1667_v0  ;;  %1496 = vmatpush3.bf16.msra.mxu1 %v1667_v0  ;;  %v1675_v4 = vld [vmem:[%s2331_s1] sm:$0xff]   ;;  %v1673_v8 = vld [vmem:[#allocation11 + $0x8] sm:$0xff]   ;;  %v1679_v12 = vld [vmem:[%s2331_s1 + $0x10] sm:$0xff]  }
  0xb6   : > { %1394 = vmatprep.subr.bf16.mxu0 %v1668_v1  ;;  %1489 = vmatprep.subr.bf16.mxu1 %v1668_v1  ;;  %v1676_v5 = vld [vmem:[%s2331_s1 + $0x20] sm:$0xff]   ;;  %v1677_v10 = vld [vmem:[%s2331_s1 + $0x8] sm:$0xff]   ;;  %v1680_v13 = vld [vmem:[%s2331_s1 + $0x30] sm:$0xff]  }
  0xb7   : > { %1408 = vmatprep.mubr.bf16.mxu0 %v1675_v4  ;;  %1416 = vmatprep.mubr.bf16.mxu1 %v1676_v5  ;;  %v1674_v9 = vld [vmem:[#allocation11] sm:$0xff]   ;;  %v1678_v11 = vld [vmem:[%s2331_s1 + $0x28] sm:$0xff]   ;;  %v1681_v14 = vld [vmem:[%s2331_s1 + $0x18] sm:$0xff]  }
  0xb8   : > { %v1682_v15 = vld [vmem:[%s2331_s1 + $0x38] sm:$0xff]  }
  0xb9   : > { %1395 = vmatpush3.bf16.msra.mxu0 %v1668_v1  ;;  %1497 = vmatpush3.bf16.msra.mxu1 %v1668_v1 }
  0xba   : > { %1396 = vmatprep.subr.bf16.mxu0 %v1669_v2  ;;  %1490 = vmatprep.subr.bf16.mxu1 %v1669_v2 }
  0xbd   : > { %1397 = vmatpush3.bf16.msra.mxu0 %v1669_v2  ;;  %1498 = vmatpush3.bf16.msra.mxu1 %v1669_v2 }
  0xbe   : > { %1398 = vmatprep.subr.bf16.mxu0 %v1670_v3  ;;  %1491 = vmatprep.subr.bf16.mxu1 %v1670_v3 }
  0xc1   : > { %1399 = vmatpush3.bf16.msra.mxu0 %v1670_v3  ;;  %1499 = vmatpush3.bf16.msra.mxu1 %v1670_v3 }
  0xc2   : > { %1400 = vmatprep.subr.bf16.mxu0 %v1671_v6  ;;  %1492 = vmatprep.subr.bf16.mxu1 %v1671_v6 }
  0xc5   : > { %1401 = vmatpush3.bf16.msra.mxu0 %v1671_v6  ;;  %1500 = vmatpush3.bf16.msra.mxu1 %v1671_v6 }
  0xc6   : > { %1402 = vmatprep.subr.bf16.mxu0 %v1672_v7  ;;  %1493 = vmatprep.subr.bf16.mxu1 %v1672_v7 }
  0xc9   : > { %1403 = vmatpush3.bf16.msra.mxu0 %v1672_v7  ;;  %1501 = vmatpush3.bf16.msra.mxu1 %v1672_v7 }
  0xca   : > { %1404 = vmatprep.subr.bf16.mxu0 %v1673_v8  ;;  %1494 = vmatprep.subr.bf16.mxu1 %v1673_v8 }
  0xcd   : > { %1405 = vmatpush3.bf16.msra.mxu0 %v1673_v8  ;;  %1502 = vmatpush3.bf16.msra.mxu1 %v1673_v8 }
  0xce   : > { %1406 = vmatprep.subr.bf16.mxu0 %v1674_v9  ;;  %1495 = vmatprep.subr.bf16.mxu1 %v1674_v9 }
  0xd1   : > { %1407 = vmatpush3.bf16.msra.mxu0 %v1674_v9  ;;  %1503 = vmatpush3.bf16.msra.mxu1 %v1674_v9 }
  0xd4   : > { %1409 = vmatmul.mubr.bf16.vlgmr.msra.gmra.mxu0 %v1677_v10  ;;  %1417 = vmatmul.mubr.bf16.vlgmr.msra.gmra.mxu1 %v1678_v11 }
  0xd5   : > { %1412 = vmatprep.mubr.bf16.mxu0 %v1679_v12  ;;  %1420 = vmatprep.mubr.bf16.mxu1 %v1680_v13 }
  0xdc   : > { %1413 = vmatmul.mubr.bf16.gmra.mxu0 %v1681_v14  ;;  %1421 = vmatmul.mubr.bf16.gmra.mxu1 %v1682_v15 }
 0x194   : > { %v1410_v16 = vpop.f32.mrf.mxu0  ;;  %v1418_v17 = vpop.f32.mrf.mxu1 }
 0x195   : > { %601 = vst [vmem:[#allocation2 + $0x58] sm:$0xff] %v1410_v16  ;;  %609 = vst [vmem:[#allocation2 + $0x10] sm:$0xff] %v1418_v17 }
 0x196   : > { %v536_v18 = vpop.f32.mrf.mxu0  ;;  %v568_v19 = vpop.f32.mrf.mxu1 }
 0x197   : > { %599 = vst [vmem:[#allocation2 + $0x30] sm:$0xff] %v536_v18  ;;  %607 = vst [vmem:[#allocation2 + $0x40] sm:$0xff] %v568_v19 }
 0x198   : > { %v1411_v20 = vpop.f32.mrf.mxu0  ;;  %v1419_v21 = vpop.f32.mrf.mxu1 }
 0x199   : > { %602 = vst [vmem:[#allocation2 + $0x18] sm:$0xff] %v1411_v20  ;;  %610 = vst [vmem:[#allocation2 + $0x38] sm:$0xff] %v1419_v21 }
 0x19a   : > { %v539_v22 = vpop.f32.mrf.mxu0  ;;  %v571_v23 = vpop.f32.mrf.mxu1 }
 0x19b   : > { %600 = vst [vmem:[#allocation2] sm:$0xff] %v539_v22  ;;  %608 = vst [vmem:[#allocation2 + $0x20] sm:$0xff] %v571_v23 }
 0x19c   : > { %v1414_v24 = vpop.f32.mrf.mxu0  ;;  %v1422_v25 = vpop.f32.mrf.mxu1 }
 0x19d   : > { %605 = vst [vmem:[#allocation2 + $0x8] sm:$0xff] %v1414_v24  ;;  %613 = vst [vmem:[#allocation2 + $0x78] sm:$0xff] %v1422_v25 }
 0x19e   : > { %v552_v26 = vpop.f32.mrf.mxu0  ;;  %v584_v27 = vpop.f32.mrf.mxu1 }
 0x19f   : > { %603 = vst [vmem:[#allocation2 + $0x50] sm:$0xff] %v552_v26  ;;  %611 = vst [vmem:[#allocation2 + $0x60] sm:$0xff] %v584_v27 }
 0x1a0   : > { %v1415_v28 = vpop.f32.mrf.mxu0  ;;  %v1423_v29 = vpop.f32.mrf.mxu1 }
 0x1a1   : > { %606 = vst [vmem:[#allocation2 + $0x48] sm:$0xff] %v1415_v28  ;;  %614 = vst [vmem:[#allocation2 + $0x28] sm:$0xff] %v1423_v29 }
 0x1a2   : > { %v555_v30 = vpop.f32.mrf.mxu0  ;;  %v587_v31 = vpop.f32.mrf.mxu1 }
 0x1a3   : > { %604 = vst [vmem:[#allocation2 + $0x68] sm:$0xff] %v555_v30  ;;  %612 = vst [vmem:[#allocation2 + $0x70] sm:$0xff] %v587_v31 }
 0x1a4 PF: > { %v1683_v32 = vld [vmem:[#allocation9 + $0x38] sm:$0xff]   ;;  %v1684_v33 = vld [vmem:[#allocation9 + $0x30] sm:$0xff]   ;;  %v1685_v34 = vld [vmem:[#allocation9 + $0x28] sm:$0xff]   ;;  %s2544_s7 = sld [smem:[#allocation19_spill]] }
 0x1a5   : > { %1424 = vmatprep.subr.bf16.mxu0 %v1683_v32  ;;  %v1686_v35 = vld [vmem:[#allocation9 + $0x20] sm:$0xff]   ;;  %v1687_v37 = vld [vmem:[#allocation9 + $0x18] sm:$0xff]   ;;  %v1688_v38 = vld [vmem:[#allocation9 + $0x10] sm:$0xff]  }
 0x1a6   : > { %1425 = vmatpush3.bf16.msra.mxu0 %v1683_v32  ;;  %v1691_v36 = vld [vmem:[%s2321_s3] sm:$0xff]   ;;  %v1689_v39 = vld [vmem:[#allocation9 + $0x8] sm:$0xff]   ;;  %v1693_v42 = vld [vmem:[%s2321_s3 + $0x10] sm:$0xff]  }
 0x1a7   : > { %1426 = vmatprep.subr.bf16.mxu0 %v1684_v33  ;;  %1440 = vmatprep.mubr.bf16.mxu0 %v1691_v36  ;;  %v1690_v40 = vld [vmem:[#allocation9] sm:$0xff]   ;;  %v1692_v41 = vld [vmem:[%s2321_s3 + $0x8] sm:$0xff]   ;;  %v1694_v43 = vld [vmem:[%s2321_s3 + $0x18] sm:$0xff]  }
 0x1a8   : > { %v1695_v44 = vld [vmem:[%s2321_s3 + $0x20] sm:$0xff]   ;;  %v1696_v45 = vld [vmem:[%s2321_s3 + $0x28] sm:$0xff]   ;;  %v1697_v46 = vld [vmem:[%s2321_s3 + $0x30] sm:$0xff]  }
 0x1a9   : > { %v1698_v47 = vld [vmem:[%s2321_s3 + $0x38] sm:$0xff]   ;;  %v1699_v48 = vld [vmem:[%s2313_s30] sm:$0xff]   ;;  %v1700_v9 = vld [vmem:[%s2313_s30 + $0x8] sm:$0xff]  }
 0x1aa   : > { %1427 = vmatpush3.bf16.msra.mxu0 %v1684_v33  ;;  %1472 = vmatprep.mubr.bf16.mxu1 %v1699_v48  ;;  %v1701_v10 = vld [vmem:[%s2313_s30 + $0x10] sm:$0xff]   ;;  %v1702_v11 = vld [vmem:[%s2313_s30 + $0x18] sm:$0xff]   ;;  %v1703_v12 = vld [vmem:[%s2313_s30 + $0x20] sm:$0xff]   ;;  %p1335_p13 = scmp.ne.s32.totalorder %s2544_s7, 2 }
 0x1ab   : > { %1428 = vmatprep.subr.bf16.mxu0 %v1685_v34  ;;  %v1704_v13 = vld [vmem:[%s2313_s30 + $0x28] sm:$0xff]   ;;  %v1705_v14 = vld [vmem:[%s2313_s30 + $0x30] sm:$0xff]   ;;  %v1706_v15 = vld [vmem:[%s2313_s30 + $0x38] sm:$0xff]  }
 0x1ac   : > { %v850_v16 = vld [vmem:[#allocation2 + $0x58] sm:$0xff]  ;;  %v848_v18 = vld [vmem:[#allocation2 + $0x30] sm:$0xff]  ;;  %v849_v24 = vld [vmem:[#allocation2] sm:$0xff] }
 0x1ad   : > { %v851_v21 = vld [vmem:[#allocation2 + $0x18] sm:$0xff]  ;;  %v854_v27 = vld [vmem:[#allocation2 + $0x8] sm:$0xff]  ;;  %v852_v30 = vld [vmem:[#allocation2 + $0x50] sm:$0xff] }
 0x1ae   : > { %1429 = vmatpush3.bf16.msra.mxu0 %v1685_v34  ;;  %v855_v33 = vld [vmem:[#allocation2 + $0x48] sm:$0xff]  ;;  %v857_v48 = vld [vmem:[#allocation2 + $0x20] sm:$0xff] }
 0x1af   : > { %1430 = vmatprep.subr.bf16.mxu0 %v1686_v35  ;;  %v853_v36 = vld [vmem:[#allocation2 + $0x68] sm:$0xff] }
 0x1b2   : > { %1431 = vmatpush3.bf16.msra.mxu0 %v1686_v35 }
 0x1b3   : > { %1432 = vmatprep.subr.bf16.mxu0 %v1687_v37 }
 0x1b6   : > { %1433 = vmatpush3.bf16.msra.mxu0 %v1687_v37 }
 0x1b7   : > { %1434 = vmatprep.subr.bf16.mxu0 %v1688_v38 }
 0x1ba   : > { %1435 = vmatpush3.bf16.msra.mxu0 %v1688_v38 }
 0x1bb   : > { %1436 = vmatprep.subr.bf16.mxu0 %v1689_v39 }
 0x1be   : > { %1437 = vmatpush3.bf16.msra.mxu0 %v1689_v39  ;;  %v858_v39 = vld [vmem:[#allocation2 + $0x10] sm:$0xff] }
 0x1bf   : > { %1438 = vmatprep.subr.bf16.mxu0 %v1690_v40 }
 0x1c2   : > { %1439 = vmatpush3.bf16.msra.mxu0 %v1690_v40 }
 0x1c5   : > { %1441 = vmatmul.mubr.bf16.vlgmr.msra.gmra.mxu0 %v1692_v41 }
 0x1c6   : > { %1444 = vmatprep.mubr.bf16.mxu0 %v1693_v42  ;;  %v856_v42 = vld [vmem:[#allocation2 + $0x40] sm:$0xff] }
 0x1cd   : > { %1445 = vmatmul.mubr.bf16.gmra.mxu0 %v1694_v43 }
 0x1ce   : > { %1448 = vmatprep.mubr.bf16.mxu0 %v1695_v44 }
 0x1d5   : > { %1449 = vmatmul.mubr.bf16.gmra.mxu0 %v1696_v45  ;;  %v859_v45 = vld [vmem:[#allocation2 + $0x38] sm:$0xff] }
 0x1d6   : > { %1452 = vmatprep.mubr.bf16.mxu0 %v1697_v46 }
 0x1dd   : > { %1453 = vmatmul.mubr.bf16.gmra.mxu0 %v1698_v47 }
 0x285   : > { %v1442_v49 = vpop.f32.mrf.mxu0 }
 0x287   : > { %v777_v50 = vpop.f32.mrf.mxu0 }
 0x289   : > { %v1443_v51 = vpop.f32.mrf.mxu0 }
 0x28a   : > { %v841_v7 = vpack.c.bf16 %v1443_v51, %v1442_v49  ;;  %v862_v51 = vld [vmem:[#allocation2 + $0x78] sm:$0xff] }
 0x28b   : > { %v780_v52 = vpop.f32.mrf.mxu0 }
 0x28c   : > { %v840_v8 = vpack.c.bf16 %v780_v52, %v777_v50 }
 0x28d   : > { %v1446_v53 = vpop.f32.mrf.mxu0 }
 0x28f   : > { %v793_v54 = vpop.f32.mrf.mxu0 }
 0x291   : > { %v1447_v55 = vpop.f32.mrf.mxu0 }
 0x292   : > { %v843_v5 = vpack.c.bf16 %v1447_v55, %v1446_v53 }
 0x293   : > { %v796_v56 = vpop.f32.mrf.mxu0 }
 0x294   : > { %v842_v6 = vpack.c.bf16 %v796_v56, %v793_v54  ;;  %v860_v54 = vld [vmem:[#allocation2 + $0x60] sm:$0xff] }
 0x295   : > { %v1450_v57 = vpop.f32.mrf.mxu0 }
 0x297   : > { %v809_v58 = vpop.f32.mrf.mxu0 }
 0x299   : > { %v1451_v59 = vpop.f32.mrf.mxu0 }
 0x29a   : > { %v845_v3 = vpack.c.bf16 %v1451_v59, %v1450_v57  ;;  %v863_v57 = vld [vmem:[#allocation2 + $0x28] sm:$0xff] }
 0x29b   : > { %v812_v60 = vpop.f32.mrf.mxu0 }
 0x29c   : > { %v844_v4 = vpack.c.bf16 %v812_v60, %v809_v58  ;;  %v861_v60 = vld [vmem:[#allocation2 + $0x70] sm:$0xff] }
 0x29d   : > { %v1454_v61 = vpop.f32.mrf.mxu0 }
 0x29f   : > { %v825_v62 = vpop.f32.mrf.mxu0 }
 0x2a1   : > { %v1455_v63 = vpop.f32.mrf.mxu0 }
 0x2a2   : > { %v847_v0 = vpack.c.bf16 %v1455_v63, %v1454_v61 }
 0x2a3   : > { %v828_v1 = vpop.f32.mrf.mxu0 }
 0x2a4   : > { %v846_v2 = vpack.c.bf16 %v828_v1, %v825_v62  ;;  %1456 = vmatprep.subr.bf16.mxu1 %v847_v0 }
 0x2a5   : > { %1457 = vmatpush3.bf16.msra.mxu1 %v847_v0 }
 0x2a6   : > { %1458 = vmatprep.subr.bf16.mxu1 %v846_v2 }
 0x2a9   : > { %1459 = vmatpush3.bf16.msra.mxu1 %v846_v2 }
 0x2aa   : > { %1460 = vmatprep.subr.bf16.mxu1 %v845_v3 }
 0x2ad   : > { %1461 = vmatpush3.bf16.msra.mxu1 %v845_v3 }
 0x2ae   : > { %1462 = vmatprep.subr.bf16.mxu1 %v844_v4 }
 0x2b1   : > { %1463 = vmatpush3.bf16.msra.mxu1 %v844_v4 }
 0x2b2   : > { %1464 = vmatprep.subr.bf16.mxu1 %v843_v5 }
 0x2b5   : > { %1465 = vmatpush3.bf16.msra.mxu1 %v843_v5 }
 0x2b6   : > { %1466 = vmatprep.subr.bf16.mxu1 %v842_v6 }
 0x2b9   : > { %1467 = vmatpush3.bf16.msra.mxu1 %v842_v6 }
 0x2ba   : > { %1468 = vmatprep.subr.bf16.mxu1 %v841_v7 }
 0x2bd   : > { %1469 = vmatpush3.bf16.msra.mxu1 %v841_v7 }
 0x2be   : > { %1470 = vmatprep.subr.bf16.mxu1 %v840_v8 }
 0x2c1   : > { %1471 = vmatpush3.bf16.msra.mxu1 %v840_v8 }
 0x2c4   : > { %1473 = vmatmul.mubr.bf16.vlgmr.msra.gmra.mxu1 %v1700_v9 }
 0x2c5   : > { %1476 = vmatprep.mubr.bf16.mxu1 %v1701_v10 }
 0x2cc   : > { %1477 = vmatmul.mubr.bf16.gmra.mxu1 %v1702_v11 }
 0x2cd   : > { %1480 = vmatprep.mubr.bf16.mxu1 %v1703_v12 }
 0x2d4   : > { %1481 = vmatmul.mubr.bf16.gmra.mxu1 %v1704_v13 }
 0x2d5   : > { %1484 = vmatprep.mubr.bf16.mxu1 %v1705_v14 }
 0x2dc   : > { %1485 = vmatmul.mubr.bf16.gmra.mxu1 %v1706_v15 }
 0x384   : > { %v1474_v17 = vpop.f32.mrf.mxu1 }
 0x385   : > { %v1027_v19 = vadd.f32 %v1474_v17, %v850_v16 }
 0x386   : > { %v962_v20 = vpop.f32.mrf.mxu1 }
 0x387   : > { %1043 = vst [vmem:[#allocation2 + $0x58] sm:$0xff] %v1027_v19  ;;  %v1025_v22 = vadd.f32 %v962_v20, %v848_v18 }
 0x388   : > { %v1475_v23 = vpop.f32.mrf.mxu1 }
 0x389   : > { %1041 = vst [vmem:[#allocation2 + $0x30] sm:$0xff] %v1025_v22  ;;  %v1028_v25 = vadd.f32 %v1475_v23, %v851_v21 }
 0x38a   : > { %v965_v26 = vpop.f32.mrf.mxu1 }
 0x38b   : > { %1044 = vst [vmem:[#allocation2 + $0x18] sm:$0xff] %v1028_v25  ;;  %v1026_v28 = vadd.f32 %v965_v26, %v849_v24 }
 0x38c   : > { %v1478_v29 = vpop.f32.mrf.mxu1 }
 0x38d   : > { %1042 = vst [vmem:[#allocation2] sm:$0xff] %v1026_v28  ;;  %v1031_v31 = vadd.f32 %v1478_v29, %v854_v27 }
 0x38e   : > { %v978_v32 = vpop.f32.mrf.mxu1 }
 0x38f   : > { %1047 = vst [vmem:[#allocation2 + $0x8] sm:$0xff] %v1031_v31  ;;  %v1029_v34 = vadd.f32 %v978_v32, %v852_v30 }
 0x390   : > { %v1479_v35 = vpop.f32.mrf.mxu1 }
 0x391   : > { %1045 = vst [vmem:[#allocation2 + $0x50] sm:$0xff] %v1029_v34  ;;  %v1032_v37 = vadd.f32 %v1479_v35, %v855_v33 }
 0x392   : > { %v981_v38 = vpop.f32.mrf.mxu1 }
 0x393   : > { %1048 = vst [vmem:[#allocation2 + $0x48] sm:$0xff] %v1032_v37  ;;  %v1030_v40 = vadd.f32 %v981_v38, %v853_v36 }
 0x394   : > { %v1482_v41 = vpop.f32.mrf.mxu1 }
 0x395   : > { %1046 = vst [vmem:[#allocation2 + $0x68] sm:$0xff] %v1030_v40  ;;  %v1035_v43 = vadd.f32 %v1482_v41, %v858_v39 }
 0x396   : > { %v994_v44 = vpop.f32.mrf.mxu1 }
 0x397   : > { %1051 = vst [vmem:[#allocation2 + $0x10] sm:$0xff] %v1035_v43  ;;  %v1033_v46 = vadd.f32 %v994_v44, %v856_v42 }
 0x398   : > { %v1483_v47 = vpop.f32.mrf.mxu1 }
 0x399   : > { %1049 = vst [vmem:[#allocation2 + $0x40] sm:$0xff] %v1033_v46  ;;  %v1036_v49 = vadd.f32 %v1483_v47, %v859_v45 }
 0x39a   : > { %v997_v50 = vpop.f32.mrf.mxu1 }
 0x39b   : > { %1052 = vst [vmem:[#allocation2 + $0x38] sm:$0xff] %v1036_v49  ;;  %v1034_v52 = vadd.f32 %v997_v50, %v857_v48 }
 0x39c   : > { %v1486_v53 = vpop.f32.mrf.mxu1 }
 0x39d   : > { %1050 = vst [vmem:[#allocation2 + $0x20] sm:$0xff] %v1034_v52  ;;  %v1039_v55 = vadd.f32 %v1486_v53, %v862_v51 }
 0x39e   : > { %v1010_v56 = vpop.f32.mrf.mxu1 }
 0x39f   : > { %1055 = vst [vmem:[#allocation2 + $0x78] sm:$0xff] %v1039_v55  ;;  %v1037_v58 = vadd.f32 %v1010_v56, %v860_v54 }
 0x3a0   : > { %v1487_v59 = vpop.f32.mrf.mxu1 }
 0x3a1   : > { %1053 = vst [vmem:[#allocation2 + $0x60] sm:$0xff] %v1037_v58  ;;  %v1040_v61 = vadd.f32 %v1487_v59, %v863_v57  ;;  %1060 = sbr.rel (%p1335_p13) target bundleno = 945 (0x3b1), region = 68 }
 0x3a2   : > { %v1013_v62 = vpop.f32.mrf.mxu1 }
 0x3a3   : > { %1056 = vst [vmem:[#allocation2 + $0x28] sm:$0xff] %v1040_v61  ;;  %v1038_v63 = vadd.f32 %v1013_v62, %v861_v60 }
 0x3a5   : > { %1054 = vst [vmem:[#allocation2 + $0x70] sm:$0xff] %v1038_v63 }
 0x3a6   : > { %v1061_v0 = vld [vmem:[#allocation2 + $0x30] sm:$0xff]  ;;  %v1062_v1 = vld [vmem:[#allocation2] sm:$0xff]  ;;  %v1063_v2 = vld [vmem:[#allocation2 + $0x58] sm:$0xff] }
 0x3a7   : > { %v1077_v3 = vmax.f32 %v1061_v0, 0.0  ;;  %v1078_v4 = vmax.f32 %v1062_v1, 0.0  ;;  %v1079_v5 = vmax.f32 %v1063_v2, 0.0  ;;  %v1064_v6 = vld [vmem:[#allocation2 + $0x18] sm:$0xff]  ;;  %v1065_v7 = vld [vmem:[#allocation2 + $0x50] sm:$0xff]  ;;  %v1066_v8 = vld [vmem:[#allocation2 + $0x68] sm:$0xff] }
 0x3a8   : > { %v1080_v9 = vmax.f32 %v1064_v6, 0.0  ;;  %v1081_v10 = vmax.f32 %v1065_v7, 0.0  ;;  %v1082_v11 = vmax.f32 %v1066_v8, 0.0  ;;  %v1067_v12 = vld [vmem:[#allocation2 + $0x8] sm:$0xff]  ;;  %v1069_v14 = vld [vmem:[#allocation2 + $0x40] sm:$0xff]  ;;  %v1071_v19 = vld [vmem:[#allocation2 + $0x10] sm:$0xff] }
 0x3a9   : > { %v1068_v13 = vld [vmem:[#allocation2 + $0x48] sm:$0xff]  ;;  %1093 = vst [vmem:[%s2342_s27] sm:$0xff] %v1077_v3  ;;  %1094 = vst [vmem:[%s2342_s27 + $0x8] sm:$0xff] %v1078_v4  ;;  %v1083_v15 = vmax.f32 %v1067_v12, 0.0  ;;  %v1085_v17 = vmax.f32 %v1069_v14, 0.0  ;;  %v1070_v18 = vld [vmem:[#allocation2 + $0x20] sm:$0xff]  ;;  %v1087_v22 = vmax.f32 %v1071_v19, 0.0 }
 0x3aa   : > { %1095 = vst [vmem:[%s2342_s27 + $0x10] sm:$0xff] %v1079_v5  ;;  %v1084_v16 = vmax.f32 %v1068_v13, 0.0  ;;  %v1072_v20 = vld [vmem:[#allocation2 + $0x38] sm:$0xff]  ;;  %1096 = vst [vmem:[%s2342_s27 + $0x18] sm:$0xff] %v1080_v9  ;;  %v1086_v21 = vmax.f32 %v1070_v18, 0.0  ;;  %v1073_v24 = vld [vmem:[#allocation2 + $0x60] sm:$0xff] }
 0x3ab   : > { %1097 = vst [vmem:[%s2342_s27 + $0x20] sm:$0xff] %v1081_v10  ;;  %1098 = vst [vmem:[%s2342_s27 + $0x28] sm:$0xff] %v1082_v11  ;;  %v1088_v23 = vmax.f32 %v1072_v20, 0.0  ;;  %v1075_v26 = vld [vmem:[#allocation2 + $0x78] sm:$0xff]  ;;  %v1089_v27 = vmax.f32 %v1073_v24, 0.0  ;;  %v1076_v30 = vld [vmem:[#allocation2 + $0x28] sm:$0xff] }
 0x3ac   : > { %v1074_v25 = vld [vmem:[#allocation2 + $0x70] sm:$0xff]  ;;  %1099 = vst [vmem:[%s2342_s27 + $0x30] sm:$0xff] %v1083_v15  ;;  %1100 = vst [vmem:[%s2342_s27 + $0x38] sm:$0xff] %v1084_v16  ;;  %v1091_v29 = vmax.f32 %v1075_v26, 0.0  ;;  %v1092_v31 = vmax.f32 %v1076_v30, 0.0 }
 0x3ad   : > { %1101 = vst [vmem:[%s2342_s27 + $0x40] sm:$0xff] %v1085_v17  ;;  %v1090_v28 = vmax.f32 %v1074_v25, 0.0  ;;  %1102 = vst [vmem:[%s2342_s27 + $0x48] sm:$0xff] %v1086_v21 }
 0x3ae   : > { %1103 = vst [vmem:[%s2342_s27 + $0x50] sm:$0xff] %v1087_v22  ;;  %1104 = vst [vmem:[%s2342_s27 + $0x58] sm:$0xff] %v1088_v23 }
 0x3af   : > { %1105 = vst [vmem:[%s2342_s27 + $0x60] sm:$0xff] %v1089_v27  ;;  %1106 = vst [vmem:[%s2342_s27 + $0x68] sm:$0xff] %v1090_v28 }
 0x3b0   : > { %1107 = vst [vmem:[%s2342_s27 + $0x70] sm:$0xff] %v1091_v29  ;;  %1108 = vst [vmem:[%s2342_s27 + $0x78] sm:$0xff] %v1092_v31 }
 0x3b1 PF: > { %s2545_s15 = sld [smem:[#allocation20_spill]]  ;;  %s1123_s11 = sshll.u32 %s2342_s27, 4  ;;  %s2393_s11 = int_to_ptr.vmem [resolvable:$true] %s1123_s11 }
 0x3b2   : > { %s2546_s30 = sld [smem:[#allocation32_spill]]  ;;  %s1110_s0 = scalar_lea.sflag [#allocation5], %s2328_s9 }
 0x3b3   : > { %s1843_s2 = scalar_lea.vmem %s2393_s11, 2048  ;;  %s2009_s10 = smov [#allocation12]  }
 0x3b4   : > { %p1844_p5 = scmp.ne.s32.totalorder %s2393_s11, %s1843_s2  ;;  %s1847_s3 = sshll.u32 %s2009_s10, 4  ;;  %s1848_s3 = int_to_ptr.vmem [resolvable:$false] %s1847_s3 }
 0x3b5   : > { %s1849_s17 = scalar_lea.vmem %s1848_s3, 4096  ;;  %p1850_p9 = scmp.lt.s32.totalorder %s2393_s11, %s1848_s3 }
 0x3b6   : > { %p1845_p0 = pnand %p1844_p5, %p2275_p11  ;;  %p1851_p2 = scmp.lt.s32.totalorder %s1849_s17, %s1843_s2 }
 0x3b7   : > { %s1343_s24 = sshll.u32 %s2545_s15, 11 }
 0x3b8   : > { %s2547_s4 = smov %s2546_s30  ;;  %s2390_s22 = scalar_lea.hbm %s2546_s30, %s1343_s24 }
 0x3b9   : > { %p1846_p3 = pneg %p1845_p0  ;;  %p1852_p8 = por %p1851_p2, %p1850_p9 }
 0x3bb   : > { %p1853_p12 = pnand %p1852_p8, %p1846_p3 }
 0x3bd   : > { %1856 = shalt.err (!%p1853_p12)
}
 0x3be   : > { %s1857_s1 = scalar_lea.hbm %s2390_s22, 2048  ;;  %s1861_s13 = scalar_lea.hbm %s2547_s4, 6144 }
 0x3bf   : > { %p1858_p6 = scmp.ne.s32.totalorder %s2390_s22, %s1857_s1  ;;  %p1862_p4 = scmp.lt.s32.totalorder %s2390_s22, %s2547_s4 }
 0x3c0   : > { %p1863_p7 = scmp.lt.s32.totalorder %s1861_s13, %s1857_s1 }
 0x3c1   : > { %p1859_p1 = pnand %p1858_p6, %p2275_p11 }
 0x3c2   : > { %p1864_p13 = por %p1863_p7, %p1862_p4 }
 0x3c3   : > { %p1860_p10 = pneg %p1859_p1 }
 0x3c5   : > { %p1865_p5 = pnand %p1864_p13, %p1860_p10 }
 0x3c7   : > { %1868 = shalt.err (!%p1865_p5)
}
 0x3c8   : > { %s2010_s24 = smov 128   ;;  %s2011_s5 = smov 8  }
 0x3c9   : > { %1519 = dma.vmem_to_hbm [thread:$0]  (%p2275_p11), %s2393_s11, 2048, %s2390_s22, %s1110_s0, %s2010_s24, %s2010_s24, %s2011_s5  }
 0x3ca PF: > { %p1547_p0 = scmp.ge.s32.totalorder %s1999_s6, 2  ;;  %s1138_s28 = sand.u32 1, %s1947_s18  }
 0x3cb   : > { %p2548_p3 = scmp.ne.s32.totalorder %s2532_s12, 0  ;;  %s1139_s30 = scalar_lea.sflag [#allocation5], %s1138_s28 }
 0x3cd   : > { %p1539_p9 = pnand %p1547_p0, %p2548_p3 }
 0x3cf   : > { %p1540_p2 = pneg %p1539_p9 }
 0x3d1   : > { %1942 = dma.done.wait (%p1540_p2), %s1139_s30, 2048  }
 0x3d2   : > { %1944 = vsyncadd (%p1540_p2), %s1139_s30, 4294965248  ;;  %s25_s6 = sadd.s32 1, %s1999_s6   ;;  %s2550_s21 = sld [smem:[#allocation18_spill]] }
 0x3d3   : > { %p2423_p8 = scmp.ge.s32.totalorder %s25_s6, 11   ;;  %s2551_s9 = sld [smem:[#allocation25_spill]] }
 0x3d4   : > { %s2552_s28 = sld [smem:[#allocation21_spill]]  ;;  %s2555_s18 = smov %s1951_s19 }
 0x3d5   : > { %s2553_s12 = sld [smem:[#allocation23_spill]]  ;;  %s2556_s19 = smov %s1955_s20 }
 0x3d6   : > { %s2554_s30 = sld [smem:[#allocation24_spill]]  ;;  %s2557_s20 = smov %s2263_s14 }
 0x3d7   : > { %s2558_s22 = smov %s1967_s23  ;;  %s2560_s24 = smov %s1975_s25 }
 0x3d8   : > { %s2561_s25 = smov %s1979_s26  ;;  %s2562_s26 = smov %s2224_s8 }
 0x3d9   : > { %s2559_s23 = smov %s2551_s9  ;;  %s2563_s27 = smov %s1991_s29 }
 0x3da   :  { %24 = sbr.rel (!%p2423_p8) target bundleno = 20 (0x14), region = 125 }
 0x3db   : > { %s2564_s29 = smov %s2553_s12 }
 0x3df   :  { %1144 = vsyncpa [#allocation4], 1 }
 0x3e0   :  { %1146 = vsyncpa [#allocation4 + $0x1], 1 }
 0x3e1   :  { %1147 = vsyncpa [#allocation7], 1 }
 0x3e2   :  { %1149 = vsyncpa [#allocation7 + $0x1], 1 }
 0x3e3   :  { %1150 = vsyncpa [#allocation10], 1 }
 0x3e4   :  { %1151 = vsyncpa [#allocation5], 1 }
 0x3e5   :  { %1153 = vsyncpa [#allocation5 + $0x1], 1 }

</bundles_post_ra>
